<compile_context>
chip_gen: v7x
topology: tpu7x:2x2x1
jax: 0.10.0
libtpu: 0.0.40
codegen_flags: <defaults>
</compile_context>

<pallas_src>
import functools

import jax
import jax.numpy as jnp
from jax.experimental import pallas as pl
from jax.experimental.pallas import tpu as pltpu

INPUT_SIZE = 784
HIDDEN = 50
NUM_CLASSES = 10
HIDDEN_PAD = 128   # lane-dense hidden width (zero-padded; inert through matmul/ReLU)
OUT_PAD = 128      # lane-dense output width (zero-padded; sliced back to 10)


def _round_up(n, m):
    return ((n + m - 1) // m) * m


def _mlp_kernel(x_ref, w1_ref, b1_ref, w2_ref, b2_ref, o_ref):
    # fc1: (TB, 784) @ (784, 128) on the MXU, f32 accumulation.
    h = jnp.dot(x_ref[...], w1_ref[...], preferred_element_type=jnp.float32)
    # Bias add + ReLU in f32 on the VPU (keeps v5e off the bf16-emulation path).
    h = jnp.maximum(h + b1_ref[...], 0.0)
    # fc2: (TB, 128) @ (128, 128), bf16 operands, f32 accumulation.
    out = jnp.dot(h.astype(w2_ref.dtype), w2_ref[...],
                  preferred_element_type=jnp.float32)
    # Lane-dense (multiple-of-128) store: plain vst, no masked partial stores.
    o_ref[...] = (out + b2_ref[...]).astype(o_ref.dtype)


def prepare_params(w1, b1, w2, b2, compute_dtype=jnp.bfloat16):
    """Zero-pad once to lane-dense widths and cast matmul operands to bf16.

    w1: (784, 50), b1: (1, 50), w2: (50, 10), b2: (1, 10)  [weights are (in, out)].
    Zero padding is numerically inert: padded hidden lanes are 0 + 0 bias,
    ReLU(0) = 0, and padded w2 rows/cols contribute nothing.
    """
    w1p = jnp.zeros((INPUT_SIZE, HIDDEN_PAD), compute_dtype)
    w1p = w1p.at[:, :HIDDEN].set(w1.astype(compute_dtype))
    b1p = jnp.zeros((1, HIDDEN_PAD), jnp.float32)
    b1p = b1p.at[:, :HIDDEN].set(b1.reshape(1, HIDDEN).astype(jnp.float32))
    w2p = jnp.zeros((HIDDEN_PAD, OUT_PAD), compute_dtype)
    w2p = w2p.at[:HIDDEN, :NUM_CLASSES].set(w2.astype(compute_dtype))
    b2p = jnp.zeros((1, OUT_PAD), jnp.float32)
    b2p = b2p.at[:, :NUM_CLASSES].set(b2.reshape(1, NUM_CLASSES).astype(jnp.float32))
    return w1p, b1p, w2p, b2p


@functools.partial(jax.jit, static_argnames=("tb",))
def nn_forward(x, w1p, b1p, w2p, b2p, *, tb=1024):
    """x: (B, 784); params pre-padded/cast via prepare_params. Returns (B, 10) f32."""
    B = x.shape[0]
    compute_dtype = w1p.dtype

    # Batch tile: sublane-aligned, bounded so a double-buffered bf16 x tile
    # (tb*784*2 bytes) fits comfortably inside v7x's 64 MiB VMEM / 32 MiB scoped limit.
    TB = min(_round_up(tb, 8), _round_up(B, 8))
    B_pad = _round_up(B, TB)

    xp = x.astype(compute_dtype)
    if B_pad != B:
        xp = jnp.pad(xp, ((0, B_pad - B), (0, 0)))

    out = pl.pallas_call(
        _mlp_kernel,
        out_shape=jax.ShapeDtypeStruct((B_pad, OUT_PAD), jnp.float32),
        grid=(B_pad // TB,),
        in_specs=[
            # x tiles stream through the pipeline.
            pl.BlockSpec((TB, INPUT_SIZE), lambda i: (i, 0)),
            # Weights/biases: constant index_map -> stay VMEM-resident across steps.
            pl.BlockSpec((INPUT_SIZE, HIDDEN_PAD), lambda i: (0, 0)),
            pl.BlockSpec((1, HIDDEN_PAD), lambda i: (0, 0)),
            pl.BlockSpec((HIDDEN_PAD, OUT_PAD), lambda i: (0, 0)),
            pl.BlockSpec((1, OUT_PAD), lambda i: (0, 0)),
        ],
        out_specs=pl.BlockSpec((TB, OUT_PAD), lambda i: (i, 0)),
        compiler_params=pltpu.CompilerParams(
            # Batch axis is independent -> megacore sharding on v7x (harmless on v5e/v6e).
            dimension_semantics=("parallel",),
        ),
    )(xp, w1p, b1p, w2p, b2p)

    return out[:B, :NUM_CLASSES]


def init_params(key):
    """Mirror PyTorch Linear default init U[-1/sqrt(fan_in), +1/sqrt(fan_in)].
    Weights stored as (in, out) == transpose of PyTorch's (out, in)."""
    k1, k2, k3, k4 = jax.random.split(key, 4)
    bound1 = 1.0 / jnp.sqrt(INPUT_SIZE)
    bound2 = 1.0 / jnp.sqrt(HIDDEN)
    w1 = jax.random.uniform(k1, (INPUT_SIZE, HIDDEN), jnp.float32, -bound1, bound1)
    b1 = jax.random.uniform(k2, (1, HIDDEN), jnp.float32, -bound1, bound1)
    w2 = jax.random.uniform(k3, (HIDDEN, NUM_CLASSES), jnp.float32, -bound2, bound2)
    b2 = jax.random.uniform(k4, (1, NUM_CLASSES), jnp.float32, -bound2, bound2)
    return w1, b1, w2, b2


if __name__ == "__main__":
    key = jax.random.PRNGKey(0)
    kx, kp = jax.random.split(key)

    # Small harness shapes; B=40 with tb=16 exercises the batch grid (3 steps)
    # and the ragged-batch padding path. (Real deployments should use B >= 128
    # per tile to fill MXU rows.)
    B = 40
    x = jax.random.normal(kx, (B, INPUT_SIZE), jnp.float32)
    w1, b1, w2, b2 = init_params(kp)
    w1p, b1p, w2p, b2p = prepare_params(w1, b1, w2, b2)

    out = nn_forward(x, w1p, b1p, w2p, b2p, tb=16)
    out = jax.block_until_ready(out)
    assert out.shape == (B, NUM_CLASSES)

    # Reference 1: mirror the kernel's bf16-operand / f32-accumulate precision.
    f32 = jnp.float32
    xb = x.astype(jnp.bfloat16).astype(f32)
    h = jnp.maximum(xb @ w1p.astype(f32) + b1p, 0.0)
    ref_bf16 = (h.astype(jnp.bfloat16).astype(f32) @ w2p.astype(f32) + b2p)[:, :NUM_CLASSES]
    assert jnp.allclose(out, ref_bf16, atol=2e-3, rtol=2e-3)

    # Reference 2: full-f32 math of the original PyTorch module (looser tolerance,
    # differences come only from the intentional bf16 operand cast).
    ref_f32 = jnp.maximum(x @ w1 + b1, 0.0) @ w2 + b2
    assert jnp.allclose(out, ref_f32, atol=1e-1, rtol=1e-1)

    print("KERNEL_OK")
</pallas_src>

<mosaic_0001>
module attributes {stable_mosaic.version = 11 : i64} {
  func.func @_mlp_kernel(%arg0: i32, %arg1: memref<16x784xbf16, #tpu.memory_space<vmem>>, %arg2: memref<784x128xbf16, #tpu.memory_space<vmem>>, %arg3: memref<1x128xf32, #tpu.memory_space<vmem>>, %arg4: memref<128x128xbf16, #tpu.memory_space<vmem>>, %arg5: memref<1x128xf32, #tpu.memory_space<vmem>>, %arg6: memref<16x128xf32, #tpu.memory_space<vmem>>) attributes {dimension_semantics = [#tpu.dimension_semantics<parallel>], iteration_bounds = array<i64: 3>, scalar_prefetch = 0 : i64, scratch_operands = 0 : i64, tpu.core_type = #tpu.core_type<tc>, window_params = [{transform_indices = @transform_0, window_bounds = array<i64: 16, 784>}, {pipeline_mode = #tpu.pipeline_mode<synchronous>, transform_indices = @transform_1, window_bounds = array<i64: 784, 128>}, {pipeline_mode = #tpu.pipeline_mode<synchronous>, transform_indices = @transform_2, window_bounds = array<i64: 1, 128>}, {pipeline_mode = #tpu.pipeline_mode<synchronous>, transform_indices = @transform_3, window_bounds = array<i64: 128, 128>}, {pipeline_mode = #tpu.pipeline_mode<synchronous>, transform_indices = @transform_4, window_bounds = array<i64: 1, 128>}, {transform_indices = @transform_5, window_bounds = array<i64: 16, 128>}]} {
    %c0 = arith.constant 0 : index
    %c0_0 = arith.constant 0 : index
    %0 = vector.load %arg1[%c0, %c0_0] : memref<16x784xbf16, #tpu.memory_space<vmem>>, vector<16x784xbf16>
    %c0_1 = arith.constant 0 : index
    %c0_2 = arith.constant 0 : index
    %1 = vector.load %arg2[%c0_1, %c0_2] : memref<784x128xbf16, #tpu.memory_space<vmem>>, vector<784x128xbf16>
    %cst = arith.constant dense<0.000000e+00> : vector<16x128xf32>
    %2 = tpu.matmul %0, %1, %cst {dimension_numbers = #tpu.dot_dimension_numbers<[1], [0], [0], [1], [0, 0, 1, 1], [], []>} : vector<16x784xbf16>, vector<784x128xbf16>, vector<16x128xf32> -> vector<16x128xf32>
    %c0_3 = arith.constant 0 : index
    %c0_4 = arith.constant 0 : index
    %3 = vector.load %arg3[%c0_3, %c0_4] : memref<1x128xf32, #tpu.memory_space<vmem>>, vector<1x128xf32>
    %4 = vector.broadcast %3 : vector<1x128xf32> to vector<16x128xf32>
    %5 = arith.addf %2, %4 : vector<16x128xf32>
    %cst_5 = arith.constant 0.000000e+00 : f32
    %6 = vector.broadcast %cst_5 : f32 to vector<16x128xf32>
    %7 = arith.maximumf %5, %6 : vector<16x128xf32>
    %8 = arith.truncf %7 : vector<16x128xf32> to vector<16x128xbf16>
    %c0_6 = arith.constant 0 : index
    %c0_7 = arith.constant 0 : index
    %9 = vector.load %arg4[%c0_6, %c0_7] : memref<128x128xbf16, #tpu.memory_space<vmem>>, vector<128x128xbf16>
    %cst_8 = arith.constant dense<0.000000e+00> : vector<16x128xf32>
    %10 = tpu.matmul %8, %9, %cst_8 {dimension_numbers = #tpu.dot_dimension_numbers<[1], [0], [0], [1], [0, 0, 1, 1], [], []>} : vector<16x128xbf16>, vector<128x128xbf16>, vector<16x128xf32> -> vector<16x128xf32>
    %c0_9 = arith.constant 0 : index
    %c0_10 = arith.constant 0 : index
    %11 = vector.load %arg5[%c0_9, %c0_10] : memref<1x128xf32, #tpu.memory_space<vmem>>, vector<1x128xf32>
    %12 = vector.broadcast %11 : vector<1x128xf32> to vector<16x128xf32>
    %13 = arith.addf %10, %12 : vector<16x128xf32>
    %c0_11 = arith.constant 0 : index
    %c0_12 = arith.constant 0 : index
    %14 = vector.load %arg6[%c0_11, %c0_12] : memref<16x128xf32, #tpu.memory_space<vmem>>, vector<16x128xf32>
    tpu.vector_store %arg6[%c0_11, %c0_12], %13 {strides = array<i32>} : memref<16x128xf32, #tpu.memory_space<vmem>>, vector<16x128xf32>,
    return
  }
  func.func @transform_0(%arg0: i32) -> (i32, i32) {
    %c0_i32 = arith.constant 0 : i32
    %c0_i32_0 = arith.constant 0 : i32
    return %arg0, %c0_i32 : i32, i32
  }
  func.func @transform_1(%arg0: i32) -> (i32, i32) {
    %c0_i32 = arith.constant 0 : i32
    %c0_i32_0 = arith.constant 0 : i32
    %c0_i32_1 = arith.constant 0 : i32
    return %c0_i32, %c0_i32_0 : i32, i32
  }
  func.func @transform_2(%arg0: i32) -> (i32, i32) {
    %c0_i32 = arith.constant 0 : i32
    %c0_i32_0 = arith.constant 0 : i32
    %c0_i32_1 = arith.constant 0 : i32
    return %c0_i32, %c0_i32_0 : i32, i32
  }
  func.func @transform_3(%arg0: i32) -> (i32, i32) {
    %c0_i32 = arith.constant 0 : i32
    %c0_i32_0 = arith.constant 0 : i32
    %c0_i32_1 = arith.constant 0 : i32
    return %c0_i32, %c0_i32_0 : i32, i32
  }
  func.func @transform_4(%arg0: i32) -> (i32, i32) {
    %c0_i32 = arith.constant 0 : i32
    %c0_i32_0 = arith.constant 0 : i32
    %c0_i32_1 = arith.constant 0 : i32
    return %c0_i32, %c0_i32_0 : i32, i32
  }
  func.func @transform_5(%arg0: i32) -> (i32, i32) {
    %c0_i32 = arith.constant 0 : i32
    %c0_i32_0 = arith.constant 0 : i32
    return %arg0, %c0_i32 : i32, i32
  }
}

</mosaic_0001>

<bundles_post_ra>
// kernel: nn_forward.1
= control target key start
LH: loop header
LB: loop body
LE: loop exit
PB: predicated region body
PF: predicated region fallthrough
CT: control target
= control target key end

     0   :  { %s1314_s18 = smov 0   ;;  %s1536_s0 = inlined_call_operand.vmem [shape: bf16[48,784], index: 0, kind: input, shape index: {}]   ;;  %s1537_s1 = inlined_call_operand.vmem [shape: bf16[784,128], index: 1, kind: input, shape index: {}]   ;;  %s1538_s2 = inlined_call_operand.vmem [shape: f32[1,128], index: 2, kind: input, shape index: {}]   ;;  %s1539_s3 = inlined_call_operand.vmem [shape: bf16[128,128], index: 3, kind: input, shape index: {}]   ;;  %s1540_s4 = inlined_call_operand.vmem [shape: f32[1,128], index: 4, kind: input, shape index: {}]   ;;  %s1541_s5 = inlined_call_operand.vmem [shape: f32[48,128], index: 5, kind: output, shape index: {}]  }
   0x1 LB: > { %s1015_s19 = sadd.s32 4294967295, %s1280_s18   ;;  %p1019_p0 = scmp.ge.s32.totalorder %s1280_s18, 1  ;;  %s1280_s18 = sphi %s1314_s18, %s15_s18  }
   0x2   : > { %p189_p1 = scmp.lt.s32.totalorder %s1280_s18, 4 }
   0x4   : > { %p190_p2 = pnand %p1019_p0, %p189_p1 }
   0x5   : > { %v1207_v0 = vld [vmem:[%s1537_s1 + $0x40] sm:$0xff] (!%p190_p2)   ;;  %v1211_v4 = vld [vmem:[%s1537_s1 + $0x48] sm:$0xff] (!%p190_p2)   ;;  %v1215_v8 = vld [vmem:[%s1537_s1 + $0x50] sm:$0xff] (!%p190_p2)   ;;  %s1020_s25 = sshll.u32 (!%p190_p2), %s1015_s19, 1  ;;  %v1282_v38 = vmov (!%p190_p2), 0.0   ;;  %vm1283_vm0 = vmmov (!%p190_p2), 0  }
   0x6   : > { %193 = sbr.rel (%p190_p2) target bundleno = 512 (0x200), region = 40  ;;  %v1208_v1 = vld [vmem:[%s1537_s1] sm:$0xff] (!%p190_p2)   ;;  %1093 = vmatprep.subr.bf16.mxu0 (!%p190_p2), %v1207_v0  ;;  %v1212_v5 = vld [vmem:[%s1537_s1 + $0x8] sm:$0xff] (!%p190_p2)   ;;  %v1216_v9 = vld [vmem:[%s1537_s1 + $0x10] sm:$0xff] (!%p190_p2)   ;;  %p219_p3 = scmp.lt.s32.totalorder (!%p190_p2), %s1020_s25, 5  ;;  %vm674_vm1 = vcmask (!%p190_p2), 130048  }
   0x7   : > { %v1209_v2 = vld [vmem:[%s1537_s1 + $0xc0] sm:$0xff] (!%p190_p2)   ;;  %1094 = vmatpush3.bf16.msra.mxu0 (!%p190_p2), %v1208_v1  ;;  %v1213_v6 = vld [vmem:[%s1537_s1 + $0xc8] sm:$0xff] (!%p190_p2)   ;;  %v1217_v10 = vld [vmem:[%s1537_s1 + $0xd0] sm:$0xff] (!%p190_p2)  }
   0x8   : > { %v1210_v3 = vld [vmem:[%s1537_s1 + $0x80] sm:$0xff] (!%p190_p2)   ;;  %1115 = vmatprep.subr.bf16.mxu1 (!%p190_p2), %v1209_v2  ;;  %1095 = vmatprep.subr.bf16.mxu0 (!%p190_p2), %v1211_v4  ;;  %v1214_v7 = vld [vmem:[%s1537_s1 + $0x88] sm:$0xff] (!%p190_p2)   ;;  %v1218_v11 = vld [vmem:[%s1537_s1 + $0x90] sm:$0xff] (!%p190_p2)  }
   0x9   : > { %1116 = vmatpush3.bf16.msra.mxu1 (!%p190_p2), %v1210_v3  ;;  %v1219_v12 = vld [vmem:[%s1537_s1 + $0x58] sm:$0xff] (!%p190_p2)   ;;  %v1223_v16 = vld [vmem:[%s1537_s1 + $0x60] sm:$0xff] (!%p190_p2)   ;;  %v1227_v20 = vld [vmem:[%s1537_s1 + $0x68] sm:$0xff] (!%p190_p2)  }
   0xa   : > { %1117 = vmatprep.subr.bf16.mxu1 (!%p190_p2), %v1213_v6  ;;  %v1220_v13 = vld [vmem:[%s1537_s1 + $0x18] sm:$0xff] (!%p190_p2)   ;;  %v1224_v17 = vld [vmem:[%s1537_s1 + $0x20] sm:$0xff] (!%p190_p2)   ;;  %v1228_v21 = vld [vmem:[%s1537_s1 + $0x28] sm:$0xff] (!%p190_p2)  }
   0xb   : > { %1096 = vmatpush3.bf16.msra.mxu0 (!%p190_p2), %v1212_v5  ;;  %v1221_v14 = vld [vmem:[%s1537_s1 + $0xd8] sm:$0xff] (!%p190_p2)   ;;  %v1225_v18 = vld [vmem:[%s1537_s1 + $0xe0] sm:$0xff] (!%p190_p2)   ;;  %v1229_v22 = vld [vmem:[%s1537_s1 + $0xe8] sm:$0xff] (!%p190_p2)  }
   0xc   : > { %1097 = vmatprep.subr.bf16.mxu0 (!%p190_p2), %v1215_v8  ;;  %v1222_v15 = vld [vmem:[%s1537_s1 + $0x98] sm:$0xff] (!%p190_p2)   ;;  %v1226_v19 = vld [vmem:[%s1537_s1 + $0xa0] sm:$0xff] (!%p190_p2)   ;;  %v1230_v23 = vld [vmem:[%s1537_s1 + $0xa8] sm:$0xff] (!%p190_p2)  }
   0xd   : > { %1118 = vmatpush3.bf16.msra.mxu1 %v1214_v7  ;;  %s1543_s25 = smov (!%p219_p3, %s1020_s25), 5  ;;  %v1231_v24 = vld [vmem:[%s1537_s1 + $0x70] sm:$0xff]   ;;  %v1235_v28 = vld [vmem:[%s1537_s1 + $0x78] sm:$0xff]   ;;  %v1242_v34 = vld [vmem:[%s1537_s1 + $0x140] sm:$0xff]  }
   0xe   : > { %1119 = vmatprep.subr.bf16.mxu1 %v1217_v10  ;;  %s1196_s24 = smul.u32 28, %s1543_s25  ;;  %v1232_v25 = vld [vmem:[%s1537_s1 + $0x30] sm:$0xff]   ;;  %v1236_v29 = vld [vmem:[%s1537_s1 + $0x38] sm:$0xff]   ;;  %v1246_v37 = vld [vmem:[%s1537_s1 + $0x100] sm:$0xff]   ;;  %s1023_s27 = sshll.u32 %s1543_s25, 3 }
   0xf   : > { %1098 = vmatpush3.bf16.msra.mxu0 %v1216_v9  ;;  %v1233_v26 = vld [vmem:[%s1537_s1 + $0xf0] sm:$0xff]   ;;  %v1237_v30 = vld [vmem:[%s1537_s1 + $0xf8] sm:$0xff]   ;;  %v1247_v39 = vld [vmem:[%s1537_s1 + $0x148] sm:$0xff]   ;;  %s229_s7 = scalar_lea.vmem %s1541_s5, %s1023_s27 }
  0x10   : > { %1099 = vmatprep.subr.bf16.mxu0 %v1219_v12  ;;  %v1234_v27 = vld [vmem:[%s1537_s1 + $0xb0] sm:$0xff]   ;;  %s1417_s10 = scalar_lea.vmem %s1536_s0, %s1196_s24  ;;  %v1241_v33 = vld [vmem:[%s1537_s1 + $0xb8] sm:$0xff]   ;;  %v1248_v40 = vld [vmem:[%s1537_s1 + $0x108] sm:$0xff]  }
  0x11   : > { %1120 = vmatpush3.bf16.msra.mxu1 %v1218_v11  ;;  %v1238_v31 = vld [vmem:[%s1417_s10] ss:$28 sps:$4 sm:$0xff]   ;;  %v1243_v35 = vld [vmem:[%s1417_s10 + $0x8] ss:$28 sps:$4 sm:$0xff]   ;;  %v1249_v41 = vld [vmem:[%s1537_s1 + $0x150] sm:$0xff]  }
  0x12   : > { %1121 = vmatprep.subr.bf16.mxu1 %v1221_v14  ;;  %v1240_v32 = vld [vmem:[%s1417_s10 + $0x4] ss:$28 sps:$4 sm:$0xff]   ;;  %v1245_v36 = vld [vmem:[%s1417_s10 + $0xc] ss:$28 sps:$4 sm:$0xff]   ;;  %v1250_v42 = vld [vmem:[%s1537_s1 + $0x110] sm:$0xff]  }
  0x13   : > { %1100 = vmatpush3.bf16.msra.mxu0 %v1220_v13  ;;  %710 = vmatprep.mubr.bf16.mxu0 %v1240_v32  ;;  %v1251_v43 = vld [vmem:[%s1537_s1 + $0x158] sm:$0xff]   ;;  %v1253_v45 = vld [vmem:[%s1537_s1 + $0x160] sm:$0xff]   ;;  %v1255_v47 = vld [vmem:[%s1537_s1 + $0x168] sm:$0xff]  }
  0x14   : > { %1101 = vmatprep.subr.bf16.mxu0 %v1223_v16  ;;  %751 = vmatprep.mubr.bf16.mxu1 %v1245_v36  ;;  %v1252_v44 = vld [vmem:[%s1537_s1 + $0x118] sm:$0xff]   ;;  %v1254_v46 = vld [vmem:[%s1537_s1 + $0x120] sm:$0xff]   ;;  %v1256_v49 = vld [vmem:[%s1537_s1 + $0x128] sm:$0xff]  }
  0x15   : > { %1122 = vmatpush3.bf16.msra.mxu1 %v1222_v15  ;;  %v1261_v48 = vld [vmem:[%s1537_s1 + $0x180] sm:$0xff]   ;;  %v1264_v50 = vld [vmem:[%s1417_s10 + $0x14] ss:$28 sps:$4 sm:$0xff]   ;;  %v1259_v54 = vld [vmem:[%s1537_s1 + $0x178] sm:$0xff]  }
  0x16   : > { %1123 = vmatprep.subr.bf16.mxu1 %v1225_v18  ;;  %v1257_v51 = vld [vmem:[%s1537_s1 + $0x170] sm:$0xff]   ;;  %v1260_v55 = vld [vmem:[%s1537_s1 + $0x138] sm:$0xff]   ;;  %v1266_v57 = vld [vmem:[%s1539_s3] sm:$0xff]  }
  0x17   : > { %1102 = vmatpush3.bf16.msra.mxu0 %v1224_v17  ;;  %v1265_v52 = vld [vmem:[%s1417_s10 + $0x18] ss:$28 sps:$4 sm:$0xff]   ;;  %v1262_v56 = vld [vmem:[%s1417_s10 + $0x10] ss:$28 sps:$4 sm:$0xff]   ;;  %v1270_v61 = vld [vmem:[%s1539_s3 + $0x20] sm:$0xff]  }
  0x18   : > { %1103 = vmatprep.subr.bf16.mxu0 %v1227_v20  ;;  %v1258_v53 = vld [vmem:[%s1537_s1 + $0x130] sm:$0xff]   ;;  %v1267_v58 = vld [vmem:[%s1539_s3 + $0x8] sm:$0xff]   ;;  %v1269_v60 = vld [vmem:[%s1539_s3 + $0x18] sm:$0xff]  }
  0x19   : > { %1124 = vmatpush3.bf16.msra.mxu1 %v1226_v19  ;;  %v1268_v59 = vld [vmem:[%s1539_s3 + $0x10] sm:$0xff]   ;;  %v1271_v62 = vld [vmem:[%s1539_s3 + $0x28] sm:$0xff]   ;;  %v1273_v0 = vld [vmem:[%s1539_s3 + $0x38] sm:$0xff]  }
  0x1a   : > { %1125 = vmatprep.subr.bf16.mxu1 %v1229_v22  ;;  %v1272_v63 = vld [vmem:[%s1539_s3 + $0x30] sm:$0xff]   ;;  %v1024_v2 = vld [vmem:[%s1538_s2] ss:$0 sm:$0xff] }
  0x1b   : > { %1104 = vmatpush3.bf16.msra.mxu0 %v1228_v21 }
  0x1c   : > { %1105 = vmatprep.subr.bf16.mxu0 %v1231_v24 }
  0x1d   : > { %1126 = vmatpush3.bf16.msra.mxu1 %v1230_v23 }
  0x1e   : > { %1127 = vmatprep.subr.bf16.mxu1 %v1233_v26 }
  0x1f   : > { %1106 = vmatpush3.bf16.msra.mxu0 %v1232_v25 }
  0x20   : > { %1107 = vmatprep.subr.bf16.mxu0 %v1235_v28 }
  0x21   : > { %1128 = vmatpush3.bf16.msra.mxu1 %v1234_v27 }
  0x22   : > { %1129 = vmatprep.subr.bf16.mxu1 %v1237_v30 }
  0x23   : > { %1108 = vmatpush3.bf16.msra.mxu0 %v1236_v29 }
  0x24   : > { %1137 = vmatprep.subr.bf16.mxu0 %v1242_v34 }
  0x25   : > { %1130 = vmatpush3.bf16.msra.mxu1 %v1241_v33 }
  0x26   : > { %711 = vmatmul.mubr.bf16.vlgmr.msra.gmra.mrb[0].mxu0 %v1238_v31  ;;  %1170 = vmatprep.subr.bf16.mxu1 %v1282_v38 }
  0x27   : > { %1138 = vmatpush3.bf16.msra.mxu0 %v1246_v37  ;;  %792 = vmatprep.mubr.bf16.mxu0 %v1264_v50 }
  0x28   : > { %752 = vmatmul.mubr.bf16.vlgmr.msra.gmra.mrb[0].mxu1 %v1243_v35  ;;  %1139 = vmatprep.subr.bf16.mxu0 %v1247_v39  ;;  %v1082_v35 = vld [vmem:[%s1540_s4] ss:$0 sm:$0xff] }
  0x29   : > { %1172 = vmatprep.mubr.msk.bf16.mxu1 %vm1283_vm0, %v1282_v38  ;;  %1171 = vmatpush3.bf16.msra.mxu1 %v1261_v48 }
  0x2a   : > { %1176 = vmatprep.subr.bf16.mxu1 %v1282_v38 }
  0x2b   : > { %1140 = vmatpush3.bf16.msra.mxu0 %v1248_v40 }
  0x2c   : > { %1141 = vmatprep.subr.bf16.mxu0 %v1249_v41 }
  0x2f   : > { %1142 = vmatpush3.bf16.msra.mxu0 %v1250_v42 }
  0x30   : > { %1143 = vmatprep.subr.bf16.mxu0 %v1251_v43  ;;  %1173 = vmatmul.mubr.msk.bf16.vlgmr.msra.gmra.mrb[4].mxu1 %vm674_vm1, %v1265_v52 }
  0x31   : > { %1192 = vmatprep.mubr.msk.bf16.mxu1 %vm1283_vm0, %v1282_v38  ;;  %1177 = vmatpush3.bf16.msra.mxu1 %v1266_v57 }
  0x32   : > { %1178 = vmatprep.subr.bf16.mxu1 %v1282_v38 }
  0x33   : > { %1144 = vmatpush3.bf16.msra.mxu0 %v1252_v44 }
  0x34   : > { %1145 = vmatprep.subr.bf16.mxu0 %v1253_v45 }
  0x35   : > { %1179 = vmatpush3.bf16.msra.mxu1 %v1267_v58 }
  0x36   : > { %1180 = vmatprep.subr.bf16.mxu1 %v1282_v38 }
  0x37   : > { %1146 = vmatpush3.bf16.msra.mxu0 %v1254_v46 }
  0x38   : > { %1147 = vmatprep.subr.bf16.mxu0 %v1255_v47 }
  0x39   : > { %1181 = vmatpush3.bf16.msra.mxu1 %v1268_v59 }
  0x3a   : > { %1182 = vmatprep.subr.bf16.mxu1 %v1282_v38 }
  0x3b   : > { %1148 = vmatpush3.bf16.msra.mxu0 %v1256_v49 }
  0x3c   : > { %1149 = vmatprep.subr.bf16.mxu0 %v1257_v51 }
  0x3d   : > { %1183 = vmatpush3.bf16.msra.mxu1 %v1269_v60 }
  0x3e   : > { %1184 = vmatprep.subr.bf16.mxu1 %v1282_v38 }
  0x3f   : > { %1150 = vmatpush3.bf16.msra.mxu0 %v1258_v53 }
  0x40   : > { %1151 = vmatprep.subr.bf16.mxu0 %v1259_v54 }
  0x41   : > { %1185 = vmatpush3.bf16.msra.mxu1 %v1270_v61 }
  0x42   : > { %1186 = vmatprep.subr.bf16.mxu1 %v1282_v38 }
  0x43   : > { %1152 = vmatpush3.bf16.msra.mxu0 %v1260_v55 }
  0x45   : > { %1187 = vmatpush3.bf16.msra.mxu1 %v1271_v62 }
  0x46   : > { %793 = vmatmul.mubr.bf16.vlgmr.msra.gmra.mrb[4].mxu0 %v1262_v56  ;;  %1188 = vmatprep.subr.bf16.mxu1 %v1282_v38 }
  0x49   : > { %1189 = vmatpush3.bf16.msra.mxu1 %v1272_v63 }
  0x4a   : > { %1190 = vmatprep.subr.bf16.mxu1 %v1282_v38 }
  0x4d   : > { %1191 = vmatpush3.bf16.msra.mxu1 %v1273_v0 }
  0xf9   : > { %v1109_v1 = vpop.f32.mrb[0].mxu0 }
  0xfa   : > { %v1110_v3 = vpop.f32.mrb[1].mxu0 }
  0xfb   : > { %v1111_v4 = vadd.f32 %v1110_v3, %v1109_v1  ;;  %v1112_v5 = vpop.f32.mrb[2].mxu0  ;;  %v1131_v6 = vpop.f32.mrb[0].mxu1 }
  0xfc   : > { %v1113_v7 = vpop.f32.mrb[3].mxu0  ;;  %v1132_v10 = vpop.f32.mrb[1].mxu1 }
  0xfd   : > { %v713_v8 = vadd.f32 %v1111_v4, %v1024_v2  ;;  %v1114_v9 = vadd.f32 %v1113_v7, %v1112_v5  ;;  %v1133_v11 = vadd.f32 %v1132_v10, %v1131_v6  ;;  %v1134_v12 = vpop.f32.mrb[2].mxu1 }
  0xfe   : > { %v1135_v14 = vpop.f32.mrb[3].mxu1 }
  0xff   : > { %v716_v13 = vadd.f32 %v1114_v9, %v1024_v2  ;;  %v754_v15 = vadd.f32 %v1133_v11, %v713_v8  ;;  %v1136_v16 = vadd.f32 %v1135_v14, %v1134_v12 }
 0x101   : > { %v757_v17 = vadd.f32 %v1136_v16, %v716_v13 }
 0x103   : > { %v835_v18 = vpop.f32.mrb[4].mxu1 }
 0x104   : > { %v1174_v19 = vpop.f32.mrb[5].mxu1 }
 0x105   : > { %v838_v20 = vpop.f32.mrb[6].mxu1 }
 0x106   : > { %v1175_v21 = vpop.f32.mrb[7].mxu1 }
 0x119   : > { %v1153_v22 = vpop.f32.mrb[4].mxu0 }
 0x11a   : > { %v1154_v23 = vpop.f32.mrb[5].mxu0 }
 0x11b   : > { %v1155_v24 = vadd.f32 %v1154_v23, %v1153_v22  ;;  %v1156_v25 = vpop.f32.mrb[6].mxu0 }
 0x11c   : > { %v1157_v26 = vpop.f32.mrb[7].mxu0 }
 0x11d   : > { %v795_v27 = vadd.f32 %v1155_v24, %v754_v15  ;;  %v1158_v28 = vadd.f32 %v1157_v26, %v1156_v25 }
 0x11f   : > { %v836_v29 = vadd.f32 %v835_v18, %v795_v27  ;;  %v798_v30 = vadd.f32 %v1158_v28, %v757_v17 }
 0x121   : > { %v839_v31 = vadd.f32 %v838_v20, %v798_v30  ;;  %v842_v32 = vmax.f32 %v836_v29, 0.0 }
 0x123   : > { %v843_v33 = vmax.f32 %v839_v31, 0.0 }
 0x125   : > { %v844_v34 = vpack.c.bf16 %v843_v33, %v842_v32 }
 0x127   : > { %1193 = vmatmul.mubr.bf16.vlgmr.msra.gmra.mrb[8].mxu1 %v844_v34 }
 0x1fa   : > { %v950_v36 = vpop.f32.mrb[8].mxu1 }
 0x1fb   : > { %v951_v37 = vadd.f32 %v1082_v35, %v950_v36  ;;  %v1194_v38 = vpop.f32.mrb[9].mxu1 }
 0x1fc   : > { %v953_v39 = vpop.f32.mrb[10].mxu1 }
 0x1fd   : > { %957 = vst [vmem:[%s229_s7] sm:$0xff] %v951_v37  ;;  %v954_v40 = vadd.f32 %v1082_v35, %v953_v39  ;;  %v1195_v41 = vpop.f32.mrb[11].mxu1 }
 0x1ff   : > { %958 = vst [vmem:[%s229_s7 + $0x8] sm:$0xff] %v954_v40 }
 0x200 PF: > { %s15_s18 = sadd.s32 1, %s1280_s18  }
 0x201   : > { %p12_p4 = scmp.ge.s32.totalorder %s15_s18, 5  }
 0x203   :  { %14 = sbr.rel (!%p12_p4) target bundleno = 1 (0x1), region = 70 }

</bundles_post_ra>
